<compile_context>
chip_gen: v7x
topology: tpu7x:2x2x1
jax: 0.10.0
libtpu: 0.0.40
codegen_flags: <defaults>
</compile_context>

<pallas_src>
from functools import partial

import jax
import jax.numpy as jnp
from jax.experimental import pallas as pl
from jax.experimental.pallas import tpu as pltpu


# ---------------------------------------------------------------------------
# Fused path: conv + bias + LeakyReLU + exact InstanceNorm, one step per batch
# ---------------------------------------------------------------------------
def fused_conv_in_kernel(patch_ref, w_ref, b_ref, o_ref,
                         *, neg_slope, eps, inv_count):
    # One MXU matmul per batch: (Cout, KCp) @ (KCp, S) -> (Cout, S), f32 acc.
    acc = jnp.dot(w_ref[...], patch_ref[...],
                  preferred_element_type=jnp.float32)
    acc = acc + b_ref[...]                                  # (Cout,1) bcast
    y = jnp.where(acc > 0, acc, neg_slope * acc)            # LeakyReLU, f32
    # Exact two-pass InstanceNorm statistics (whole slab is resident).
    mean = jnp.sum(y, axis=1, keepdims=True) * inv_count
    d = y - mean
    var = jnp.sum(d * d, axis=1, keepdims=True) * inv_count
    o_ref[...] = (d * jax.lax.rsqrt(var + eps)).astype(o_ref.dtype)


# ---------------------------------------------------------------------------
# Two-pass path, kernel 1: conv + bias + LeakyReLU + per-channel sum / sumsq.
# ---------------------------------------------------------------------------
def conv_act_stats_kernel(patch_ref, w_ref, b_ref,          # inputs
                          y_ref, sum_ref, ssq_ref,           # outputs
                          *, neg_slope, tail_valid):
    j = pl.program_id(1)

    @pl.when(j == 0)
    def _init():
        sum_ref[...] = jnp.zeros_like(sum_ref)
        ssq_ref[...] = jnp.zeros_like(ssq_ref)

    acc = jnp.dot(w_ref[...], patch_ref[...],
                  preferred_element_type=jnp.float32)
    acc = acc + b_ref[...]
    y = jnp.where(acc > 0, acc, neg_slope * acc)
    y_ref[...] = y.astype(y_ref.dtype)      # bf16 HBM intermediate

    # Stats accumulate in f32 from the pre-cast values.
    # NOTE: single-pass var = E[y^2]-E[y]^2 can lose precision for very large
    # S; kernel 2 clamps var >= 0.  (Fused path uses exact two-pass stats.)
    def _accum(yv):
        sum_ref[...] = sum_ref[...] + jnp.sum(yv, axis=1, keepdims=True)
        ssq_ref[...] = ssq_ref[...] + jnp.sum(yv * yv, axis=1, keepdims=True)

    if tail_valid is None:                   # tS divides S: never mask
        _accum(y)
    else:
        last = pl.num_programs(1) - 1

        @pl.when(j != last)
        def _interior():
            _accum(y)

        @pl.when(j == last)
        def _tail():
            # The last block is partial; columns >= tail_valid hold
            # unspecified data.  Use a select (NOT a multiply) so NaN garbage
            # cannot leak into the statistics.
            lane = jax.lax.broadcasted_iota(jnp.int32, y.shape, 1)
            _accum(jnp.where(lane < tail_valid, y, 0.0))


# ---------------------------------------------------------------------------
# Two-pass path, kernel 2: normalize each S tile from the (n, channel) stats.
# ---------------------------------------------------------------------------
def instancenorm_kernel(y_ref, sum_ref, ssq_ref, o_ref, *, inv_count, eps):
    mean = sum_ref[...] * inv_count                         # (Cout, 1)
    var = jnp.maximum(ssq_ref[...] * inv_count - mean * mean, 0.0)
    scale = jax.lax.rsqrt(var + eps)
    y = y_ref[...].astype(jnp.float32)
    o_ref[...] = ((y - mean) * scale).astype(o_ref.dtype)


# ---------------------------------------------------------------------------
# Wrapper
# ---------------------------------------------------------------------------
def _round_up(v, m):
    return ((v + m - 1) // m) * m


def _vmem_budget_bytes():
    """Generation-aware scoped-VMEM budget (~3/4 physical, capped at 100 MiB).

    v5e/v6e (128 MiB physical) -> ~96 MiB; v7x (64 MiB physical) -> 48 MiB.
    Falls back to the conservative v7x figure if the query is unavailable.
    """
    try:
        phys = int(pltpu.get_tpu_info().vmem_capacity_bytes)
    except Exception:
        phys = 64 * 1024 * 1024
    return max(32 * 1024 * 1024, min(phys * 3 // 4, 100 * 1024 * 1024))


def dilated_conv_block(x, weight, bias, padding, dilate,
                       neg_slope=0.2, eps=1e-5, block_s=4096,
                       force_two_pass=False):
    """x: (N, Cin, D, H, W) NCDHW like PyTorch. Returns NCDHW output."""
    N, Cin, D, H, W = x.shape
    Cout = weight.shape[0]
    k = 3
    span = dilate * (k - 1)
    Do, Ho, Wo = D + 2 * padding - span, H + 2 * padding - span, W + 2 * padding - span
    assert Do > 0 and Ho > 0 and Wo > 0, "invalid conv geometry"
    S = Do * Ho * Wo
    KC = k * k * k * Cin
    KC_pad = _round_up(KC, 128)          # keep the MXU K dim 128-aligned

    budget = _vmem_budget_bytes()
    out_bytes = x.dtype.itemsize

    # --- glue: zero-pad spatially, im2col -> (N, KC_pad, S) bf16.
    # Built in a single concatenate (zero rows folded in), already bf16, so
    # the 27x patch tensor is materialized exactly once and never re-padded.
    xp = jnp.pad(x, ((0, 0), (0, 0),
                     (padding, padding), (padding, padding),
                     (padding, padding)))
    taps = []
    for kd in range(k):
        for kh in range(k):
            for kw in range(k):
                sl = xp[:, :,
                        kd * dilate:kd * dilate + Do,
                        kh * dilate:kh * dilate + Ho,
                        kw * dilate:kw * dilate + Wo]
                taps.append(sl.reshape(N, Cin, S).astype(jnp.bfloat16))
    if KC_pad > KC:
        taps.append(jnp.zeros((N, KC_pad - KC, S), jnp.bfloat16))
    patches = jnp.concatenate(taps, axis=1)                  # (N, KC_pad, S)

    # weight (Cout, Cin, kd, kh, kw) -> (Cout, KC_pad) matching tap ordering.
    w2 = jnp.transpose(weight, (0, 2, 3, 4, 1)).reshape(Cout, KC)
    w2 = jnp.pad(w2, ((0, 0), (0, KC_pad - KC))).astype(jnp.bfloat16)
    b2 = bias.reshape(Cout, 1).astype(jnp.float32)

    # ---- path selection: fused single pass if the per-batch slab fits. ----
    fused_need = (2 * (KC_pad * S * 2 + Cout * S * out_bytes)
                  + Cout * KC_pad * 2 + (1 << 20))
    use_fused = (not force_two_pass) and fused_need <= budget // 2

    if use_fused:
        out_flat = pl.pallas_call(
            partial(fused_conv_in_kernel, neg_slope=neg_slope, eps=eps,
                    inv_count=1.0 / float(S)),
            out_shape=jax.ShapeDtypeStruct((N, Cout, S), x.dtype),
            grid_spec=pltpu.PrefetchScalarGridSpec(
                num_scalar_prefetch=0,
                grid=(N,),
                in_specs=[
                    pl.BlockSpec((None, KC_pad, S), lambda n: (n, 0, 0)),
                    pl.BlockSpec((Cout, KC_pad), lambda n: (0, 0)),
                    pl.BlockSpec((Cout, 1), lambda n: (0, 0)),
                ],
                out_specs=pl.BlockSpec((None, Cout, S), lambda n: (n, 0, 0)),
            ),
            compiler_params=pltpu.CompilerParams(
                dimension_semantics=("parallel",),
                vmem_limit_bytes=budget),
        )(patches, w2, b2)
        return out_flat.reshape(N, Cout, Do, Ho, Wo)

    # ---- streaming two-pass path (large volumes). ----
    # Tile size: as large as the VMEM budget allows (lane-dense multiple of
    # 128); per-column double-buffered cost of pass 1 is the binding term.
    per_col = 2 * (KC_pad * 2 + Cout * 2)
    tS_cap = max(128, ((budget // 2) // per_col) // 128 * 128)
    tS = max(128, min(_round_up(block_s, 128), tS_cap, _round_up(S, 128)))
    n_tiles = -(-S // tS)
    tail = S - (n_tiles - 1) * tS
    tail_valid = None if tail == tS else tail     # None => never mask

    # Pass 1: conv + bias + LeakyReLU + stats (y kept in bf16 in HBM).
    y_flat, ch_sum, ch_ssq = pl.pallas_call(
        partial(conv_act_stats_kernel, neg_slope=neg_slope,
                tail_valid=tail_valid),
        out_shape=(
            jax.ShapeDtypeStruct((N, Cout, S), jnp.bfloat16),
            jax.ShapeDtypeStruct((N, Cout, 1), jnp.float32),
            jax.ShapeDtypeStruct((N, Cout, 1), jnp.float32),
        ),
        grid_spec=pltpu.PrefetchScalarGridSpec(
            num_scalar_prefetch=0,
            grid=(N, n_tiles),
            in_specs=[
                pl.BlockSpec((None, KC_pad, tS), lambda n, j: (n, 0, j)),
                pl.BlockSpec((Cout, KC_pad), lambda n, j: (0, 0)),
                pl.BlockSpec((Cout, 1), lambda n, j: (0, 0)),
            ],
            out_specs=[
                pl.BlockSpec((None, Cout, tS), lambda n, j: (n, 0, j)),
                pl.BlockSpec((None, Cout, 1), lambda n, j: (n, 0, 0)),
                pl.BlockSpec((None, Cout, 1), lambda n, j: (n, 0, 0)),
            ],
        ),
        compiler_params=pltpu.CompilerParams(
            dimension_semantics=("parallel", "arbitrary"),
            vmem_limit_bytes=budget),
    )(patches, w2, b2)

    # Pass 2: normalize each S tile; output is exactly (N, Cout, S) so the
    # final reshape to NCDHW is free (last block is a masked partial write).
    out_flat = pl.pallas_call(
        partial(instancenorm_kernel, inv_count=1.0 / float(S), eps=eps),
        out_shape=jax.ShapeDtypeStruct((N, Cout, S), x.dtype),
        grid_spec=pltpu.PrefetchScalarGridSpec(
            num_scalar_prefetch=0,
            grid=(N, n_tiles),
            in_specs=[
                pl.BlockSpec((None, Cout, tS), lambda n, j: (n, 0, j)),
                pl.BlockSpec((None, Cout, 1), lambda n, j: (n, 0, 0)),
                pl.BlockSpec((None, Cout, 1), lambda n, j: (n, 0, 0)),
            ],
            out_specs=pl.BlockSpec((None, Cout, tS), lambda n, j: (n, 0, j)),
        ),
        compiler_params=pltpu.CompilerParams(
            dimension_semantics=("parallel", "parallel"),
            vmem_limit_bytes=budget),
    )(y_flat, ch_sum, ch_ssq)

    return out_flat.reshape(N, Cout, Do, Ho, Wo)


# ---------------------------------------------------------------------------
# Pure-JAX reference (module semantics) for correctness checking.
# ---------------------------------------------------------------------------
def reference(x, weight, bias, padding, dilate, neg_slope=0.2, eps=1e-5):
    y = jax.lax.conv_general_dilated(
        x, weight, window_strides=(1, 1, 1),
        padding=[(padding, padding)] * 3,
        rhs_dilation=(dilate, dilate, dilate),
        dimension_numbers=('NCDHW', 'OIDHW', 'NCDHW'))
    y = y + bias.reshape(1, -1, 1, 1, 1)
    y = jnp.where(y > 0, y, neg_slope * y)
    mean = jnp.mean(y, axis=(2, 3, 4), keepdims=True)
    var = jnp.mean((y - mean) ** 2, axis=(2, 3, 4), keepdims=True)
    return (y - mean) * jax.lax.rsqrt(var + eps)


if __name__ == "__main__":
    key = jax.random.PRNGKey(0)
    N, Cin, Cout, D, H, W = 2, 4, 8, 8, 8, 8
    dilate, padding = 2, 2          # "same"-style: Do = 8 + 4 - 4 = 8

    k1, k2, k3 = jax.random.split(key, 3)
    x = jax.random.normal(k1, (N, Cin, D, H, W), jnp.float32)
    # deterministic Conv3d-style init (uniform in +/- 1/sqrt(fan_in))
    fan_in = Cin * 3 * 3 * 3
    bound = 1.0 / (fan_in ** 0.5)
    weight = jax.random.uniform(k2, (Cout, Cin, 3, 3, 3), jnp.float32,
                                -bound, bound)
    bias = jax.random.uniform(k3, (Cout,), jnp.float32, -bound, bound)

    ref = reference(x, weight, bias, padding, dilate)

    # 1) Fused single-pass path (per-batch slab fits VMEM at this size).
    out_fused = jax.block_until_ready(
        dilated_conv_block(x, weight, bias, padding, dilate))

    # 2) Streaming two-pass path, forced, with a small tile (tS=384 over
    #    S=512) so it exercises multiple S tiles, the last-tile-only stats
    #    mask and the partial (masked) last output block.
    out_stream = jax.block_until_ready(
        dilated_conv_block(x, weight, bias, padding, dilate,
                           block_s=384, force_two_pass=True))

    for name, out in (("fused", out_fused), ("two_pass", out_stream)):
        assert out.shape == ref.shape == (N, Cout, D, H, W), (name, out.shape)
        err = jnp.abs(out - ref)
        max_err = float(jnp.max(err))
        mean_err = float(jnp.mean(err))
        # bf16 matmul operands (+ bf16 intermediate on the streaming path),
        # f32 accumulation everywhere.
        if max_err > 6e-2 or mean_err > 1.2e-2:
            raise AssertionError(
                f"{name}: mismatch vs reference: max abs err = {max_err}, "
                f"mean abs err = {mean_err}")

    print("KERNEL_OK")
</pallas_src>

<mosaic_0001>
module attributes {stable_mosaic.version = 11 : i64} {
  func.func @fused_conv_in_kernel(%arg0: i32, %arg1: memref<1x128x512xbf16, #tpu.memory_space<vmem>>, %arg2: memref<8x128xbf16, #tpu.memory_space<vmem>>, %arg3: memref<8x1xf32, #tpu.memory_space<vmem>>, %arg4: memref<1x8x512xf32, #tpu.memory_space<vmem>>) attributes {dimension_semantics = [#tpu.dimension_semantics<parallel>], iteration_bounds = array<i64: 2>, scalar_prefetch = 0 : i64, scratch_operands = 0 : i64, tpu.core_type = #tpu.core_type<tc>, window_params = [{transform_indices = @transform_0, window_bounds = array<i64: 1, 128, 512>}, {pipeline_mode = #tpu.pipeline_mode<synchronous>, transform_indices = @transform_1, window_bounds = array<i64: 8, 128>}, {pipeline_mode = #tpu.pipeline_mode<synchronous>, transform_indices = @transform_2, window_bounds = array<i64: 8, 1>}, {transform_indices = @transform_3, window_bounds = array<i64: 1, 8, 512>}]} {
    %c0 = arith.constant 0 : index
    %c0_0 = arith.constant 0 : index
    %0 = vector.load %arg2[%c0, %c0_0] : memref<8x128xbf16, #tpu.memory_space<vmem>>, vector<8x128xbf16>
    %c0_1 = arith.constant 0 : index
    %c0_2 = arith.constant 0 : index
    %c0_3 = arith.constant 0 : index
    %1 = vector.load %arg1[%c0_1, %c0_2, %c0_3] : memref<1x128x512xbf16, #tpu.memory_space<vmem>>, vector<1x128x512xbf16>
    %2 = vector.shape_cast %1 : vector<1x128x512xbf16> to vector<128x512xbf16>
    %cst = arith.constant dense<0.000000e+00> : vector<8x512xf32>
    %3 = tpu.matmul %0, %2, %cst {dimension_numbers = #tpu.dot_dimension_numbers<[1], [0], [0], [1], [0, 0, 1, 1], [], []>} : vector<8x128xbf16>, vector<128x512xbf16>, vector<8x512xf32> -> vector<8x512xf32>
    %c0_4 = arith.constant 0 : index
    %c0_5 = arith.constant 0 : index
    %4 = vector.load %arg3[%c0_4, %c0_5] : memref<8x1xf32, #tpu.memory_space<vmem>>, vector<8x1xf32>
    %5 = vector.broadcast %4 : vector<8x1xf32> to vector<8x512xf32>
    %6 = arith.addf %3, %5 : vector<8x512xf32>
    %cst_6 = arith.constant 0.000000e+00 : f32
    %7 = vector.broadcast %cst_6 : f32 to vector<8x512xf32>
    %8 = arith.cmpf ogt, %6, %7 : vector<8x512xf32>
    %cst_7 = arith.constant 2.000000e-01 : f32
    %9 = vector.broadcast %cst_7 : f32 to vector<8x512xf32>
    %10 = arith.mulf %9, %6 : vector<8x512xf32>
    %11 = arith.select %8, %6, %10 : vector<8x512xi1>, vector<8x512xf32>
    %cst_8 = arith.constant dense<0.000000e+00> : vector<8xf32>
    %12 = vector.multi_reduction <add>, %11, %cst_8 [1] : vector<8x512xf32> to vector<8xf32>
    %13 = vector.shape_cast %12 : vector<8xf32> to vector<8x1xf32>
    %cst_9 = arith.constant 0.001953125 : f32
    %14 = vector.broadcast %cst_9 : f32 to vector<8x1xf32>
    %15 = arith.mulf %13, %14 : vector<8x1xf32>
    %16 = vector.broadcast %15 : vector<8x1xf32> to vector<8x512xf32>
    %17 = arith.subf %11, %16 : vector<8x512xf32>
    %18 = arith.mulf %17, %17 : vector<8x512xf32>
    %cst_10 = arith.constant dense<0.000000e+00> : vector<8xf32>
    %19 = vector.multi_reduction <add>, %18, %cst_10 [1] : vector<8x512xf32> to vector<8xf32>
    %20 = vector.shape_cast %19 : vector<8xf32> to vector<8x1xf32>
    %cst_11 = arith.constant 0.001953125 : f32
    %21 = vector.broadcast %cst_11 : f32 to vector<8x1xf32>
    %22 = arith.mulf %20, %21 : vector<8x1xf32>
    %cst_12 = arith.constant 9.99999974E-6 : f32
    %23 = vector.broadcast %cst_12 : f32 to vector<8x1xf32>
    %24 = arith.addf %22, %23 : vector<8x1xf32>
    %25 = math.rsqrt %24 : vector<8x1xf32>
    %26 = vector.broadcast %25 : vector<8x1xf32> to vector<8x512xf32>
    %27 = arith.mulf %17, %26 : vector<8x512xf32>
    %c0_13 = arith.constant 0 : index
    %c0_14 = arith.constant 0 : index
    %c0_15 = arith.constant 0 : index
    %28 = vector.load %arg4[%c0_13, %c0_14, %c0_15] : memref<1x8x512xf32, #tpu.memory_space<vmem>>, vector<1x8x512xf32>
    %29 = vector.shape_cast %28 : vector<1x8x512xf32> to vector<8x512xf32>
    %30 = vector.shape_cast %27 : vector<8x512xf32> to vector<1x8x512xf32>
    tpu.vector_store %arg4[%c0_13, %c0_14, %c0_15], %30 {strides = array<i32>} : memref<1x8x512xf32, #tpu.memory_space<vmem>>, vector<1x8x512xf32>,
    return
  }
  func.func @transform_0(%arg0: i32) -> (i32, i32, i32) {
    %c0_i32 = arith.constant 0 : i32
    %c0_i32_0 = arith.constant 0 : i32
    %c0_i32_1 = arith.constant 0 : i32
    return %arg0, %c0_i32, %c0_i32_0 : i32, i32, i32
  }
  func.func @transform_1(%arg0: i32) -> (i32, i32) {
    %c0_i32 = arith.constant 0 : i32
    %c0_i32_0 = arith.constant 0 : i32
    %c0_i32_1 = arith.constant 0 : i32
    return %c0_i32, %c0_i32_0 : i32, i32
  }
  func.func @transform_2(%arg0: i32) -> (i32, i32) {
    %c0_i32 = arith.constant 0 : i32
    %c0_i32_0 = arith.constant 0 : i32
    %c0_i32_1 = arith.constant 0 : i32
    return %c0_i32, %c0_i32_0 : i32, i32
  }
  func.func @transform_3(%arg0: i32) -> (i32, i32, i32) {
    %c0_i32 = arith.constant 0 : i32
    %c0_i32_0 = arith.constant 0 : i32
    %c0_i32_1 = arith.constant 0 : i32
    return %arg0, %c0_i32, %c0_i32_0 : i32, i32, i32
  }
}

</mosaic_0001>

<bundles_post_ra>
// kernel: tpu_custom_call.1
= control target key start
LH: loop header
LB: loop body
LE: loop exit
PB: predicated region body
PF: predicated region fallthrough
CT: control target
= control target key end

     0   :  { %8 = vsyncpa [#allocation3], 0  ;;  %s1070_s0 = inlined_call_operand.hbm [shape: bf16[2,128,512], index: 0, kind: input, shape index: {}]   ;;  %s1071_s1 = inlined_call_operand.vmem [shape: bf16[8,128], index: 1, kind: input, shape index: {}]   ;;  %s1072_s2 = inlined_call_operand.vmem [shape: f32[8,1], index: 2, kind: input, shape index: {}]   ;;  %s1073_s3 = inlined_call_operand.hbm [shape: f32[2,8,512], index: 3, kind: output, shape index: {}]  }
   0x1   :  { %10 = vsyncpa [#allocation3 + $0x1], 0 }
   0x2   :  { %11 = vsyncpa [#allocation4], 0 }
   0x3   :  { %13 = vsyncpa [#allocation4 + $0x1], 0  ;;  %s869_s12 = smov 0   ;;  %s871_s13 = smov 0  }
   0x4   :  { %s873_s14 = smov 0   ;;  %s875_s15 = smov 0  }
   0x5 LB: > { %s890_s16 = sadd.s32 4294967295, %s842_s15   ;;  %s598_s17 = sadd.s32 4294967294, %s842_s15   ;;  %s842_s15 = sphi %s875_s15, %s1086_s15   ;;  %s838_s14 = sphi %s873_s14, %s1085_s14   ;;  %s834_s13 = sphi %s871_s13, %s1084_s13   ;;  %s830_s12 = sphi %s869_s12, %s1083_s12  }
   0x6   : > { %s894_s18 = sadd.s32 1, %s842_s15   ;;  %s26_s19 = sadd.s32 1, %s838_s14 }
   0x7   : > { %s23_s20 = ssub.s32 %s842_s15, %s894_s18  ;;  %p33_p0 = scmp.ne.s32.totalorder %s838_s14, %s834_s13 }
   0x8   : > { %p24_p1 = scmp.eq.s32.totalorder %s23_s20, 0  ;;  %p34_p2 = scmp.eq.s32.totalorder %s842_s15, 0 }
   0x9   : > { %p39_p3 = scmp.ne.s32.totalorder %s834_s13, %s830_s12  ;;  %p40_p4 = scmp.eq.s32.totalorder %s890_s16, 0 }
   0xa   : > { %s906_s21 = scalar_select %p24_p1, %s838_s14, %s26_s19  }
   0xb   : > { %p908_p5 = por %p34_p2, %p33_p0  ;;  %p912_p6 = por %p40_p4, %p39_p3 }
   0xc   : > { %p105_p7 = scmp.eq.s32.totalorder %s890_s16, 1  ;;  %p111_p8 = scmp.eq.s32.totalorder %s598_s17, 1 }
   0xd   : > { %p658_p10 = scmp.lt.s32.totalorder %s842_s15, 2  ;;  %s137_s26 = sand.u32 1, %s838_s14  }
   0xe   : > { %p919_p11 = por %p105_p7, %p33_p0  ;;  %p923_p12 = por %p111_p8, %p39_p3 }
   0xf   : > { %s644_s27 = sshll.u32 %s842_s15, 12  ;;  %s601_s28 = sshll.u32 %s137_s26, 8 }
  0x10   : > { %s1077_s24 = scalar_select %p919_p11, 1, 0 }
  0x11   : > { %s1078_s25 = scalar_select %p923_p12, 1, 0 }
  0x12   : > { %s932_s4 = scalar_lea.hbm %s1070_s0, %s644_s27  ;;  %s141_s5 = scalar_lea.vmem [#allocation2], %s601_s28 }
  0x13   : > { %s148_s6 = sshll.u32 %s141_s5, 4  ;;  %p936_p13 = pnand %p658_p10, %p908_p5  ;;  %s940_s6 = int_to_ptr.vmem [resolvable:$true] %s148_s6 }
  0x14   : > { %s942_s8 = scalar_lea.sflag [#allocation3], %s137_s26  ;;  %s746_s9 = scalar_lea.hbm %s932_s4, 4096 }
  0x15   : > { %p747_p0 = scmp.ne.s32.totalorder %s932_s4, %s746_s9  ;;  %p748_p1 = pneg %p936_p13 }
  0x16   : > { %s751_s17 = scalar_lea.hbm %s1070_s0, 8192  ;;  %p752_p4 = scmp.lt.u32.totalorder %s932_s4, %s1070_s0 }
  0x17   : > { %p749_p2 = pnand %p748_p1, %p747_p0  ;;  %p753_p5 = scmp.lt.u32.totalorder %s751_s17, %s746_s9 }
  0x18   : > { %p755_p8 = scmp.lt.u32.totalorder %s746_s9, %s932_s4 }
  0x19   : > { %p750_p3 = pneg %p749_p2  ;;  %p754_p7 = por %p753_p5, %p752_p4 }
  0x1b   : > { %p756_p10 = por %p755_p8, %p754_p7 }
  0x1d   : > { %p757_p9 = pnand %p756_p10, %p750_p3 }
  0x1f   : > { %760 = shalt.err (!%p757_p9)
}
  0x20   : > { %s761_s22 = scalar_lea.vmem %s940_s6, 4096  ;;  %s844_s26 = smov [#allocation2]  }
  0x21   : > { %p762_p0 = scmp.ne.s32.totalorder %s940_s6, %s761_s22  ;;  %s766_s27 = sshll.u32 %s844_s26, 4  ;;  %s767_s27 = int_to_ptr.vmem [resolvable:$false] %s766_s27 }
  0x22   : > { %s768_s28 = scalar_lea.vmem %s767_s27, 8192  ;;  %p769_p11 = scmp.lt.s32.totalorder %s940_s6, %s767_s27 }
  0x23   : > { %p764_p2 = pnand %p762_p0, %p748_p1  ;;  %p770_p4 = scmp.lt.s32.totalorder %s768_s28, %s761_s22 }
  0x25   : > { %p765_p12 = pneg %p764_p2  ;;  %p771_p5 = por %p770_p4, %p769_p11 }
  0x27   : > { %p772_p7 = pnand %p771_p5, %p765_p12 }
  0x29   : > { %775 = shalt.err (!%p772_p7)
}
  0x2a   : > { %s845_s29 = smov 256   ;;  %s846_s30 = smov 16  }
  0x2b   : > { %653 = dma.hbm_to_vmem [thread:$0]  (!%p936_p13), %s932_s4, 4096, %s940_s6, %s942_s8, %s845_s29, %s845_s29, %s846_s30  }
  0x2c   : > { %p604_p9 = scmp.ge.s32.totalorder %s842_s15, 1  ;;  %p156_p1 = scmp.lt.s32.totalorder %s842_s15, 3 }
  0x2e   : > { %p157_p3 = pnand %p604_p9, %p156_p1 }
  0x2f   : > { %s973_s5 = sand.u32 (!%p157_p3), 1, %s834_s13  }
  0x30   : > { %160 = sbr.rel (%p157_p3) target bundleno = 642 (0x282), region = 32  ;;  %s605_s9 = sshll.u32 (!%p157_p3), %s973_s5, 8 }
  0x31   : > { %s163_s10 = scalar_lea.sflag (!%p157_p3), [#allocation3], %s973_s5  ;;  %s977_s11 = scalar_lea.vmem (!%p157_p3), [#allocation2], %s605_s9 }
  0x37   : > { %821 = dma.done.wait (%p912_p6), %s163_s10, 4096  }
  0x38   : > { %823 = vsyncadd (%p912_p6), %s163_s10, 4294963200  ;;  %v847_v0 = vmov 0   ;;  %v696_v1 = vld [vmem:[%s977_s11 + $0x4] ss:$16 sps:$4 sm:$0xff]   ;;  %v698_v2 = vld [vmem:[%s977_s11 + $0xc] ss:$16 sps:$4 sm:$0xff]  }
  0x39   : > { %421 = vmatprep.mubr.bf16.mxu0 %v847_v0  ;;  %462 = vmatprep.mubr.bf16.mxu1 %v847_v0  ;;  %v700_v3 = vld [vmem:[%s977_s11] ss:$16 sps:$4 sm:$0xff]   ;;  %v701_v4 = vld [vmem:[%s977_s11 + $0x8] ss:$16 sps:$4 sm:$0xff]   ;;  %v702_v5 = vld [vmem:[%s977_s11 + $0x24] ss:$16 sps:$4 sm:$0xff]  }
  0x3a   : > { %695 = vset.pattern.permute.xlu0 %v847_v0  ;;  %389 = vmatprep.subr.bf16.mxu0 %v696_v1  ;;  %v704_v6 = vld [vmem:[%s977_s11 + $0x2c] ss:$16 sps:$4 sm:$0xff]   ;;  %v706_v7 = vld [vmem:[%s977_s11 + $0x20] ss:$16 sps:$4 sm:$0xff]   ;;  %v707_v8 = vld [vmem:[%s977_s11 + $0x28] ss:$16 sps:$4 sm:$0xff]  }
  0x3b   : > { %430 = vmatprep.subr.bf16.mxu1 %v698_v2  ;;  %390 = vmatpush1.bf16.msra.mxu0 %v700_v3  ;;  %v708_v9 = vld [vmem:[%s977_s11 + $0x44] ss:$16 sps:$4 sm:$0xff]   ;;  %v710_v10 = vld [vmem:[%s977_s11 + $0x4c] ss:$16 sps:$4 sm:$0xff]   ;;  %v712_v11 = vld [vmem:[%s977_s11 + $0x40] ss:$16 sps:$4 sm:$0xff]  }
  0x3c   : > { %431 = vmatpush1.bf16.msra.mxu1 %v701_v4  ;;  %391 = vmatprep.subr.bf16.mxu0 %v702_v5  ;;  %v713_v12 = vld [vmem:[%s977_s11 + $0x48] ss:$16 sps:$4 sm:$0xff]   ;;  %v714_v13 = vld [vmem:[%s977_s11 + $0x64] ss:$16 sps:$4 sm:$0xff]   ;;  %v716_v14 = vld [vmem:[%s977_s11 + $0x6c] ss:$16 sps:$4 sm:$0xff]  }
  0x3d   : > { %432 = vmatprep.subr.bf16.mxu1 %v704_v6  ;;  %v718_v15 = vld [vmem:[%s977_s11 + $0x60] ss:$16 sps:$4 sm:$0xff]   ;;  %v719_v16 = vld [vmem:[%s977_s11 + $0x68] ss:$16 sps:$4 sm:$0xff]   ;;  %v720_v17 = vld [vmem:[%s977_s11 + $0x84] ss:$16 sps:$4 sm:$0xff]  }
  0x3e   : > { %v722_v18 = vld [vmem:[%s977_s11 + $0x8c] ss:$16 sps:$4 sm:$0xff]   ;;  %v724_v19 = vld [vmem:[%s977_s11 + $0x80] ss:$16 sps:$4 sm:$0xff]   ;;  %v725_v20 = vld [vmem:[%s977_s11 + $0x88] ss:$16 sps:$4 sm:$0xff]  }
  0x3f   : > { %392 = vmatpush1.bf16.msra.mxu0 %v706_v7  ;;  %v726_v21 = vld [vmem:[%s977_s11 + $0xa4] ss:$16 sps:$4 sm:$0xff]   ;;  %v728_v22 = vld [vmem:[%s977_s11 + $0xac] ss:$16 sps:$4 sm:$0xff]   ;;  %v730_v23 = vld [vmem:[%s977_s11 + $0xa0] ss:$16 sps:$4 sm:$0xff]  }
  0x40   : > { %433 = vmatpush1.bf16.msra.mxu1 %v707_v8  ;;  %393 = vmatprep.subr.bf16.mxu0 %v708_v9  ;;  %v731_v24 = vld [vmem:[%s977_s11 + $0xa8] ss:$16 sps:$4 sm:$0xff]   ;;  %v732_v25 = vld [vmem:[%s977_s11 + $0xc4] ss:$16 sps:$4 sm:$0xff]   ;;  %v734_v26 = vld [vmem:[%s977_s11 + $0xcc] ss:$16 sps:$4 sm:$0xff]  }
  0x41   : > { %434 = vmatprep.subr.bf16.mxu1 %v710_v10  ;;  %v223_v27 = vld [vmem:[%s1072_s2] sm:$0xff]  ;;  %v737_v29 = vld [vmem:[%s977_s11 + $0xc8] ss:$16 sps:$4 sm:$0xff]   ;;  %v740_v31 = vld [vmem:[%s977_s11 + $0xec] ss:$16 sps:$4 sm:$0xff]   ;;  %s606_s8 = sshll.u32 %s973_s5, 5 }
  0x42   : > { %226 = vperm.xlu0 %695, %v223_v27   ;;  %v736_v28 = vld [vmem:[%s977_s11 + $0xc0] ss:$16 sps:$4 sm:$0xff]   ;;  %v738_v30 = vld [vmem:[%s977_s11 + $0xe4] ss:$16 sps:$4 sm:$0xff]   ;;  %v743_v33 = vld [vmem:[%s977_s11 + $0xe8] ss:$16 sps:$4 sm:$0xff]  }
  0x43   : > { %394 = vmatpush1.bf16.msra.mxu0 %v712_v11  ;;  %v742_v32 = vld [vmem:[%s977_s11 + $0xe0] ss:$16 sps:$4 sm:$0xff]   ;;  %s645_s17 = sshll.u32 %s890_s16, 9  ;;  %s188_s19 = scalar_lea.vmem [#allocation5], %s606_s8 }
  0x44   : > { %435 = vmatpush1.bf16.msra.mxu1 %v713_v12  ;;  %395 = vmatprep.subr.bf16.mxu0 %v714_v13  ;;  %v190_v34 = vld [vmem:[%s1071_s1] sm:$0xf]  ;;  %s528_s20 = sshll.u32 %s188_s19, 4  ;;  %s1026_s27 = scalar_lea.hbm %s1073_s3, %s645_s17  ;;  %s1028_s20 = int_to_ptr.vmem [resolvable:$true] %s528_s20 }
  0x45   : > { %436 = vmatprep.subr.bf16.mxu1 %v716_v14  ;;  %s514_s16 = scalar_lea.sflag [#allocation4], %s973_s5  ;;  %s776_s28 = scalar_lea.vmem %s1028_s20, 512 }
  0x46   : > { %p777_p6 = scmp.ne.s32.totalorder %s1028_s20, %s776_s28  ;;  %p1080_p11 = scmp.ne.s32.totalorder %s1077_s24, 0 }
  0x47   : > { %396 = vmatpush1.bf16.msra.mxu0 %v718_v15  ;;  %s848_s29 = smov [#allocation5]  }
  0x48   : > { %437 = vmatpush1.bf16.msra.mxu1 %v719_v16  ;;  %397 = vmatprep.subr.bf16.mxu0 %v720_v17  ;;  %p778_p12 = pnand %p777_p6, %p1080_p11  ;;  %s780_s30 = sshll.u32 %s848_s29, 4  ;;  %s781_s30 = int_to_ptr.vmem [resolvable:$false] %s780_s30 }
  0x49   : > { %438 = vmatprep.subr.bf16.mxu1 %v722_v18  ;;  %s782_s9 = scalar_lea.vmem %s781_s30, 1024  ;;  %p783_p8 = scmp.lt.s32.totalorder %s1028_s20, %s781_s30 }
  0x4a   : > { %p779_p13 = pneg %p778_p12  ;;  %p784_p10 = scmp.lt.s32.totalorder %s782_s9, %s776_s28 }
  0x4b   : > { %398 = vmatpush1.bf16.msra.mxu0 %v724_v19 }
  0x4c   : > { %439 = vmatpush1.bf16.msra.mxu1 %v725_v20  ;;  %399 = vmatprep.subr.bf16.mxu0 %v726_v21  ;;  %p785_p0 = por %p784_p10, %p783_p8 }
  0x4d   : > { %440 = vmatprep.subr.bf16.mxu1 %v728_v22 }
  0x4e   : > { %p786_p2 = pnand %p785_p0, %p779_p13 }
  0x4f   : > { %400 = vmatpush1.bf16.msra.mxu0 %v730_v23 }
  0x50   : > { %441 = vmatpush1.bf16.msra.mxu1 %v731_v24  ;;  %401 = vmatprep.subr.bf16.mxu0 %v732_v25 }
  0x51   : > { %442 = vmatprep.subr.bf16.mxu1 %v734_v26 }
  0x53   : > { %402 = vmatpush1.bf16.msra.mxu0 %v736_v28 }
  0x54   : > { %443 = vmatpush1.bf16.msra.mxu1 %v737_v29  ;;  %403 = vmatprep.subr.bf16.mxu0 %v738_v30 }
  0x55   : > { %444 = vmatprep.subr.bf16.mxu1 %v740_v31 }
  0x57   : > { %404 = vmatpush1.bf16.msra.mxu0 %v742_v32 }
  0x58   : > { %445 = vmatpush1.bf16.msra.mxu1 %v743_v33 }
  0x5a   : > { %422 = vmatmul.mubr.bf16.vlgmr.msra.gmra.mrb[0].mxu0 %v190_v34 }
  0x5b   : > { %463 = vmatmul.mubr.bf16.vlgmr.msra.gmra.mrb[0].mxu1 %v190_v34 }
  0xc1   : > { %v227_v35 = vpop.permute.xlu0 %226 }
 0x12d   : > { %v423_v36 = vpop.f32.mrb[0].mxu0 }
 0x12e   : > { %v464_v37 = vpop.f32.mrb[0].mxu1  ;;  %v424_v38 = vadd.f32 %v423_v36, %v227_v35  ;;  %v425_v40 = vpop.f32.mrb[1].mxu0 }
 0x12f   : > { %v465_v39 = vadd.f32 %v464_v37, %v227_v35  ;;  %v466_v41 = vpop.f32.mrb[1].mxu1  ;;  %v426_v42 = vadd.f32 %v425_v40, %v227_v35  ;;  %v427_v44 = vpop.f32.mrb[2].mxu0 }
 0x130   : > { %v467_v43 = vadd.f32 %v466_v41, %v227_v35  ;;  %v468_v45 = vpop.f32.mrb[2].mxu1  ;;  %vm471_vm0 = vcmp.gt.f32.partialorder %v424_v38, 0.0  ;;  %v475_v46 = vmul.f32 0.2, %v424_v38  ;;  %v428_v49 = vpop.f32.mrb[3].mxu0 }
 0x131   : > { %v477_v47 = vmul.f32 0.2, %v465_v39  ;;  %vm472_vm1 = vcmp.gt.f32.partialorder %v426_v42, 0.0  ;;  %v476_v48 = vmul.f32 0.2, %v426_v42  ;;  %vm473_vm2 = vcmp.gt.f32.partialorder %v465_v39, 0.0 }
 0x132   : > { %v479_v50 = vsel %vm471_vm0, %v424_v38, %v475_v46  ;;  %v469_v51 = vpop.f32.mrb[3].mxu1  ;;  %v478_v53 = vmul.f32 0.2, %v467_v43  ;;  %vm474_vm3 = vcmp.gt.f32.partialorder %v467_v43, 0.0 }
 0x133   : > { %v480_v52 = vsel %vm472_vm1, %v426_v42, %v476_v48  ;;  %v481_v55 = vsel %vm473_vm2, %v465_v39, %v477_v47 }
 0x134   : > { %v483_v54 = vadd.f32 %v480_v52, %v479_v50  ;;  %v482_v57 = vsel %vm474_vm3, %v467_v43, %v478_v53 }
 0x136   : > { %v484_v56 = vadd.f32 %v483_v54, %v481_v55 }
 0x138   : > { %v485_v58 = vadd.f32 %v484_v56, %v482_v57 }
 0x13a   : > { %486 = vadd.xlane.f32.xlu0 %v485_v58 }
 0x1c7   : > { %v487_v59 = vpop.xlane.xlu0 %486 }
 0x1c8   : > { %v488_v60 = vmul.f32 0.001953125, %v487_v59 }
 0x1ca   : > { %v489_v61 = vsub.f32 %v479_v50, %v488_v60  ;;  %v490_v62 = vsub.f32 %v480_v52, %v488_v60  ;;  %v491_v63 = vsub.f32 %v481_v55, %v488_v60  ;;  %v492_v0 = vsub.f32 %v482_v57, %v488_v60 }
 0x1cc   : > { %v493_v1 = vmul.f32 %v489_v61, %v489_v61  ;;  %v494_v2 = vmul.f32 %v490_v62, %v490_v62  ;;  %v495_v3 = vmul.f32 %v491_v63, %v491_v63  ;;  %v496_v5 = vmul.f32 %v492_v0, %v492_v0 }
 0x1ce   : > { %v497_v4 = vadd.f32 %v494_v2, %v493_v1 }
 0x1d0   : > { %v498_v6 = vadd.f32 %v497_v4, %v495_v3 }
 0x1d2   : > { %v499_v7 = vadd.f32 %v498_v6, %v496_v5 }
 0x1d4   : > { %500 = vadd.xlane.f32.xlu1 %v499_v7 }
 0x261   : > { %v501_v8 = vpop.xlane.xlu1 %500 }
 0x262   : > { %v502_v9 = vmul.f32 0.001953125, %v501_v8 }
 0x264   : > { %v503_v10 = vadd.f32 1e-05, %v502_v9 }
 0x266   : > { %744 = vrsqrt.f32 %v503_v10 }
 0x270   : > { %v745_v11 = vpop.eup %744 }
 0x271   : > { %v505_v12 = vmul.f32 %v745_v11, %v489_v61  ;;  %v506_v13 = vmul.f32 %v745_v11, %v490_v62  ;;  %v507_v14 = vmul.f32 %v745_v11, %v491_v63  ;;  %v508_v15 = vmul.f32 %v745_v11, %v492_v0 }
 0x273   : > { %509 = vst [vmem:[%s188_s19] sm:$0xff] %v505_v12  ;;  %510 = vst [vmem:[%s188_s19 + $0x8] sm:$0xff] %v506_v13 }
 0x274   : > { %511 = vst [vmem:[%s188_s19 + $0x10] sm:$0xff] %v507_v14  ;;  %512 = vst [vmem:[%s188_s19 + $0x18] sm:$0xff] %v508_v15 }
 0x275   : > { %789 = shalt.err (!%p786_p2)
}
 0x276   : > { %s790_s5 = scalar_lea.hbm %s1026_s27, 512  ;;  %s794_s23 = scalar_lea.hbm %s1073_s3, 1024 }
 0x277   : > { %p791_p4 = scmp.ne.s32.totalorder %s1026_s27, %s790_s5  ;;  %p795_p9 = scmp.lt.u32.totalorder %s1026_s27, %s1073_s3 }
 0x278   : > { %p796_p1 = scmp.lt.u32.totalorder %s794_s23, %s790_s5  ;;  %p798_p6 = scmp.lt.u32.totalorder %s790_s5, %s1026_s27 }
 0x279   : > { %p792_p5 = pnand %p791_p4, %p1080_p11 }
 0x27a   : > { %p797_p3 = por %p796_p1, %p795_p9 }
 0x27b   : > { %p793_p7 = pneg %p792_p5 }
 0x27c   : > { %p799_p12 = por %p798_p6, %p797_p3 }
 0x27e   : > { %p800_p13 = pnand %p799_p12, %p793_p7 }
 0x280   : > { %803 = shalt.err (!%p800_p13)
}
 0x281   : > { %648 = dma.vmem_to_hbm [thread:$0]  (%p1080_p11), %s1028_s20, 512, %s1026_s27, %s514_s16  }
 0x282 PF: > { %s540_s7 = sand.u32 1, %s830_s12   ;;  %p1081_p8 = scmp.ne.s32.totalorder %s1078_s25, 0 }
 0x283   : > { %p1082_p10 = scmp.ge.s32.totalorder %s842_s15, 2  ;;  %s541_s8 = scalar_lea.sflag [#allocation4], %s540_s7 }
 0x285   : > { %p655_p0 = pnand %p1082_p10, %p1081_p8 }
 0x287   : > { %825 = dma.done.wait (!%p655_p0), %s541_s8, 512  }
 0x288   : > { %827 = vsyncadd (!%p655_p0), %s541_s8, 4294966784  ;;  %p16_p2 = scmp.ge.s32.totalorder %s894_s18, 4   ;;  %s1083_s12 = smov %s834_s13 }
 0x289   : > { %s1084_s13 = smov %s838_s14  ;;  %s1085_s14 = smov %s906_s21 }
 0x28a   : > { %s1086_s15 = smov %s894_s18  ;;  %18 = sbr.rel (!%p16_p2) target bundleno = 5 (0x5), region = 77 }
 0x291   :  { %546 = vsyncpa [#allocation3], 1 }
 0x292   :  { %548 = vsyncpa [#allocation3 + $0x1], 1 }
 0x293   :  { %549 = vsyncpa [#allocation4], 1 }
 0x294   :  { %551 = vsyncpa [#allocation4 + $0x1], 1 }

</bundles_post_ra>
